<compile_context>
chip_gen: v7x
topology: tpu7x:2x2x1
jax: 0.10.0
libtpu: 0.0.40
codegen_flags: <defaults>
</compile_context>

<pallas_src>
import functools
import math

import jax
import jax.numpy as jnp
from jax import lax
from jax.experimental import pallas as pl
from jax.experimental.pallas import tpu as pltpu


def _round_up(x, m):
    return (x + m - 1) // m * m


def _flash_sdpa_kernel(q_ref, k_ref, v_ref, o_ref,
                       m_ref, l_ref, acc_ref, qs_ref,
                       *, scale, kv_len, block_k):
    ki = pl.program_id(2)
    nk = pl.num_programs(2)

    @pl.when(ki == 0)
    def _init():
        m_ref[...] = jnp.full_like(m_ref, -jnp.inf)
        l_ref[...] = jnp.zeros_like(l_ref)
        acc_ref[...] = jnp.zeros_like(acc_ref)
        # Hoist q * scale out of the kv loop: the q block is constant across
        # ki, so scale it once per q tile into VMEM scratch.
        qs_ref[...] = q_ref[0] * scale

    q = qs_ref[...]               # (tq, D), already scaled (scale incl. log2e)
    k = k_ref[0]                  # (tk, D)
    v = v_ref[0]                  # (tk, D)

    # scores (log2 domain): contract on D for both operands -> MXU consumes K
    # directly, no explicit transpose of the K tile.
    s = lax.dot_general(q, k,
                        dimension_numbers=(((1,), (1,)), ((), ())),
                        preferred_element_type=jnp.float32)   # (tq, tk) f32

    def update(s_tile):
        m_prev = m_ref[...]                                   # (tq, 1)
        m_new = jnp.maximum(m_prev, jnp.max(s_tile, axis=-1, keepdims=True))
        alpha = jnp.exp2(m_prev - m_new)
        p = jnp.exp2(s_tile - m_new)                          # unnormalized
        l_ref[...] = alpha * l_ref[...] + jnp.sum(p, axis=-1, keepdims=True)
        acc_ref[...] = alpha * acc_ref[...] + lax.dot_general(
            p.astype(v.dtype), v,
            dimension_numbers=(((1,), (0,)), ((), ())),
            preferred_element_type=jnp.float32)               # (tq, D) f32
        m_ref[...] = m_new

    if kv_len % block_k != 0:
        # Only the last kv tile can contain padded columns -> gate the mask.
        # Invariant (asserted in wrapper): the last tile always has >= 1
        # valid column, so no tile is fully masked.
        @pl.when(ki == nk - 1)
        def _masked():
            col = ki * block_k + lax.broadcasted_iota(jnp.int32, s.shape, 1)
            update(jnp.where(col < kv_len, s, -1e30))

        @pl.when(ki != nk - 1)
        def _unmasked():
            update(s)
    else:
        update(s)

    @pl.when(ki == nk - 1)
    def _finalize():
        # Normalize once, after the PV matmul (tq x D muls, not tq x tk).
        inv_l = pl.reciprocal(l_ref[...], approx=True)
        o_ref[0] = (acc_ref[...] * inv_l).astype(o_ref.dtype)


def scaled_dot_product_attention(q, k, v, d_model, *, block_q=256, block_k=512,
                                 compute_dtype=jnp.bfloat16):
    """q, k, v: [B, S, D]. Returns [B, S, D] in q.dtype.

    compute_dtype (default bf16) is used for the two MXU matmuls; softmax
    statistics and accumulation stay f32. Pass compute_dtype=None to keep the
    input dtype end-to-end.
    """
    B, S, D = q.shape
    assert k.shape == (B, S, D) and v.shape == (B, S, D)

    # exp2 trick: fold log2(e) into the softmax scale.
    scale = math.log2(math.e) / math.sqrt(float(d_model))

    cdt = compute_dtype if compute_dtype is not None else q.dtype
    isz = jnp.dtype(cdt).itemsize
    sub = {4: 8, 2: 16, 1: 32}.get(isz, 8)   # sublane multiple per dtype

    # Lane-dense head dim; sequence padded to (dtype-aware) tile multiples.
    Dp = _round_up(D, 128)
    tq = min(block_q, _round_up(S, sub))
    tk = min(block_k, _round_up(S, sub))

    # Keep >= 2 q-tiles when B == 1 so both v7x TensorCores get work.
    if B == 1:
        half = _round_up(-(-S // 2), sub)
        if half < _round_up(S, sub):
            tq = min(tq, half)

    Sq = _round_up(S, tq)
    Sk = _round_up(S, tk)
    # No kv tile is fully padded (mask relies on this).
    assert Sk - S < tk

    def prep(x, s_pad):
        if compute_dtype is not None and x.dtype != compute_dtype:
            x = x.astype(compute_dtype)          # cast before pad/DMA: half the bytes
        if s_pad != S or Dp != D:
            x = jnp.pad(x, ((0, 0), (0, s_pad - S), (0, Dp - D)))
        return x

    qp, kp, vp = prep(q, Sq), prep(k, Sk), prep(v, Sk)

    kernel = functools.partial(_flash_sdpa_kernel, scale=scale, kv_len=S,
                               block_k=tk)

    out = pl.pallas_call(
        kernel,
        out_shape=jax.ShapeDtypeStruct((B, Sq, Dp), q.dtype),
        grid_spec=pltpu.PrefetchScalarGridSpec(
            num_scalar_prefetch=0,
            grid=(B, Sq // tq, Sk // tk),
            in_specs=[
                pl.BlockSpec((1, tq, Dp), lambda b, qi, ki: (b, qi, 0)),
                pl.BlockSpec((1, tk, Dp), lambda b, qi, ki: (b, ki, 0)),
                pl.BlockSpec((1, tk, Dp), lambda b, qi, ki: (b, ki, 0)),
            ],
            out_specs=pl.BlockSpec((1, tq, Dp), lambda b, qi, ki: (b, qi, 0)),
            scratch_shapes=[
                pltpu.VMEM((tq, 1), jnp.float32),    # running max m (log2 dom)
                pltpu.VMEM((tq, 1), jnp.float32),    # running denom l
                pltpu.VMEM((tq, Dp), jnp.float32),   # output accumulator
                pltpu.VMEM((tq, Dp), qp.dtype),      # scaled q (hoisted)
            ],
        ),
        compiler_params=pltpu.CompilerParams(
            dimension_semantics=("parallel", "parallel", "arbitrary"),
            vmem_limit_bytes=32 * 1024 * 1024,       # headroom under v7x 64 MiB
        ),
    )(qp, kp, vp)

    if Sq != S or Dp != D:
        out = out[:, :S, :D]
    return out


def _reference(q, k, v, d_model):
    scores = jnp.einsum("bsd,btd->bst", q, k) / jnp.sqrt(jnp.float32(d_model))
    w = jax.nn.softmax(scores, axis=-1)
    return jnp.einsum("bst,btd->bsd", w, v)


if __name__ == "__main__":
    # Small deterministic example: batch=2, seq=8, d_model=32
    B, S, D = 2, 8, 32
    key = jax.random.PRNGKey(0)
    kq, kk, kv = jax.random.split(key, 3)
    q = jax.random.normal(kq, (B, S, D), dtype=jnp.float32)
    k = jax.random.normal(kk, (B, S, D), dtype=jnp.float32)
    v = jax.random.normal(kv, (B, S, D), dtype=jnp.float32)

    out = scaled_dot_product_attention(q, k, v, d_model=D)
    out = jax.block_until_ready(out)

    ref = _reference(q, k, v, d_model=D)
    assert out.shape == (B, S, D)
    # bf16 MXU operands + approx reciprocal -> bf16-level tolerance vs f32 ref
    assert jnp.allclose(out, ref, atol=3e-2, rtol=3e-2), "mismatch vs reference"

    print("KERNEL_OK")
</pallas_src>

<mosaic_0001>
module attributes {stable_mosaic.version = 11 : i64} {
  func.func @_flash_sdpa_kernel(%arg0: i32, %arg1: i32, %arg2: i32, %arg3: memref<1x16x128xbf16, #tpu.memory_space<vmem>>, %arg4: memref<1x16x128xbf16, #tpu.memory_space<vmem>>, %arg5: memref<1x16x128xbf16, #tpu.memory_space<vmem>>, %arg6: memref<1x16x128xf32, #tpu.memory_space<vmem>>, %arg7: memref<16x1xf32, #tpu.memory_space<vmem>>, %arg8: memref<16x1xf32, #tpu.memory_space<vmem>>, %arg9: memref<16x128xf32, #tpu.memory_space<vmem>>, %arg10: memref<16x128xbf16, #tpu.memory_space<vmem>>) attributes {dimension_semantics = [#tpu.dimension_semantics<parallel>, #tpu.dimension_semantics<parallel>, #tpu.dimension_semantics<arbitrary>], iteration_bounds = array<i64: 2, 1, 1>, scalar_prefetch = 0 : i64, scratch_operands = 4 : i64, tpu.core_type = #tpu.core_type<tc>, window_params = [{transform_indices = @transform_0, window_bounds = array<i64: 1, 16, 128>}, {transform_indices = @transform_1, window_bounds = array<i64: 1, 16, 128>}, {transform_indices = @transform_2, window_bounds = array<i64: 1, 16, 128>}, {transform_indices = @transform_3, window_bounds = array<i64: 1, 16, 128>}]} {
    %c0_i32 = arith.constant 0 : i32
    %0 = arith.cmpi eq, %arg2, %c0_i32 : i32
    %1 = arith.extui %0 : i1 to i32
    %c0_i32_0 = arith.constant 0 : i32
    %2 = arith.cmpi ne, %1, %c0_i32_0 : i32
    scf.if %2 {
      %cst_14 = arith.constant 0xFF800000 : f32
      %18 = vector.broadcast %cst_14 : f32 to vector<16x1xf32>
      %c0_15 = arith.constant 0 : index
      %c0_16 = arith.constant 0 : index
      %19 = vector.load %arg7[%c0_15, %c0_16] : memref<16x1xf32, #tpu.memory_space<vmem>>, vector<16x1xf32>
      tpu.vector_store %arg7[%c0_15, %c0_16], %18 {strides = array<i32>} : memref<16x1xf32, #tpu.memory_space<vmem>>, vector<16x1xf32>,
      %cst_17 = arith.constant 0.000000e+00 : f32
      %20 = vector.broadcast %cst_17 : f32 to vector<16x1xf32>
      %c0_18 = arith.constant 0 : index
      %c0_19 = arith.constant 0 : index
      %21 = vector.load %arg8[%c0_18, %c0_19] : memref<16x1xf32, #tpu.memory_space<vmem>>, vector<16x1xf32>
      tpu.vector_store %arg8[%c0_18, %c0_19], %20 {strides = array<i32>} : memref<16x1xf32, #tpu.memory_space<vmem>>, vector<16x1xf32>,
      %cst_20 = arith.constant 0.000000e+00 : f32
      %22 = vector.broadcast %cst_20 : f32 to vector<16x128xf32>
      %c0_21 = arith.constant 0 : index
      %c0_22 = arith.constant 0 : index
      %23 = vector.load %arg9[%c0_21, %c0_22] : memref<16x128xf32, #tpu.memory_space<vmem>>, vector<16x128xf32>
      tpu.vector_store %arg9[%c0_21, %c0_22], %22 {strides = array<i32>} : memref<16x128xf32, #tpu.memory_space<vmem>>, vector<16x128xf32>,
      %c0_23 = arith.constant 0 : index
      %c0_24 = arith.constant 0 : index
      %c0_25 = arith.constant 0 : index
      %24 = vector.load %arg3[%c0_23, %c0_24, %c0_25] : memref<1x16x128xbf16, #tpu.memory_space<vmem>>, vector<1x16x128xbf16>
      %25 = vector.shape_cast %24 : vector<1x16x128xbf16> to vector<16x128xbf16>
      %cst_26 = arith.constant 2.558590e-01 : bf16
      %26 = vector.broadcast %cst_26 : bf16 to vector<16x128xbf16>
      %27 = arith.mulf %25, %26 : vector<16x128xbf16>
      %c0_27 = arith.constant 0 : index
      %c0_28 = arith.constant 0 : index
      %28 = vector.load %arg10[%c0_27, %c0_28] : memref<16x128xbf16, #tpu.memory_space<vmem>>, vector<16x128xbf16>
      tpu.vector_store %arg10[%c0_27, %c0_28], %27 {strides = array<i32>} : memref<16x128xbf16, #tpu.memory_space<vmem>>, vector<16x128xbf16>,
    } else {
    }
    %c0 = arith.constant 0 : index
    %c0_1 = arith.constant 0 : index
    %3 = vector.load %arg10[%c0, %c0_1] : memref<16x128xbf16, #tpu.memory_space<vmem>>, vector<16x128xbf16>
    %c0_2 = arith.constant 0 : index
    %c0_3 = arith.constant 0 : index
    %c0_4 = arith.constant 0 : index
    %4 = vector.load %arg4[%c0_2, %c0_3, %c0_4] : memref<1x16x128xbf16, #tpu.memory_space<vmem>>, vector<1x16x128xbf16>
    %5 = vector.shape_cast %4 : vector<1x16x128xbf16> to vector<16x128xbf16>
    %c0_5 = arith.constant 0 : index
    %c0_6 = arith.constant 0 : index
    %c0_7 = arith.constant 0 : index
    %6 = vector.load %arg5[%c0_5, %c0_6, %c0_7] : memref<1x16x128xbf16, #tpu.memory_space<vmem>>, vector<1x16x128xbf16>
    %7 = vector.shape_cast %6 : vector<1x16x128xbf16> to vector<16x128xbf16>
    %cst = arith.constant dense<0.000000e+00> : vector<16x16xf32>
    %8 = tpu.matmul %3, %5, %cst {dimension_numbers = #tpu.dot_dimension_numbers<[1], [1], [0], [0], [0, 0, 1, 0], [], []>} : vector<16x128xbf16>, vector<16x128xbf16>, vector<16x16xf32> -> vector<16x16xf32>
    %c0_i32_8 = arith.constant 0 : i32
    %9 = arith.cmpi eq, %arg2, %c0_i32_8 : i32
    %10 = arith.extui %9 : i1 to i32
    %c0_i32_9 = arith.constant 0 : i32
    %11 = arith.cmpi ne, %10, %c0_i32_9 : i32
    scf.if %11 {
      %c16_i32 = arith.constant 16 : i32
      %18 = arith.muli %arg2, %c16_i32 : i32
      %19 = tpu.iota {dimensions = array<i32: 1>} : vector<16x16xi32>
      %20 = vector.broadcast %18 : i32 to vector<16x16xi32>
      %21 = arith.addi %20, %19 : vector<16x16xi32>
      %c8_i32 = arith.constant 8 : i32
      %22 = vector.broadcast %c8_i32 : i32 to vector<16x16xi32>
      %23 = arith.cmpi slt, %21, %22 : vector<16x16xi32>
      %cst_14 = arith.constant -1.000000e+30 : f32
      %24 = vector.broadcast %cst_14 : f32 to vector<16x16xf32>
      %25 = arith.select %23, %8, %24 : vector<16x16xi1>, vector<16x16xf32>
      %c0_15 = arith.constant 0 : index
      %c0_16 = arith.constant 0 : index
      %26 = vector.load %arg7[%c0_15, %c0_16] : memref<16x1xf32, #tpu.memory_space<vmem>>, vector<16x1xf32>
      %cst_17 = arith.constant dense<0xFF800000> : vector<16xf32>
      %27 = vector.multi_reduction <maximumf>, %25, %cst_17 [1] : vector<16x16xf32> to vector<16xf32>
      %28 = vector.shape_cast %27 : vector<16xf32> to vector<16x1xf32>
      %29 = arith.maximumf %26, %28 : vector<16x1xf32>
      %30 = arith.subf %26, %29 : vector<16x1xf32>
      %31 = math.exp2 %30 : vector<16x1xf32>
      %32 = vector.broadcast %29 : vector<16x1xf32> to vector<16x16xf32>
      %33 = arith.subf %25, %32 : vector<16x16xf32>
      %34 = math.exp2 %33 : vector<16x16xf32>
      %c0_18 = arith.constant 0 : index
      %c0_19 = arith.constant 0 : index
      %35 = vector.load %arg8[%c0_18, %c0_19] : memref<16x1xf32, #tpu.memory_space<vmem>>, vector<16x1xf32>
      %36 = arith.mulf %31, %35 : vector<16x1xf32>
      %cst_20 = arith.constant dense<0.000000e+00> : vector<16xf32>
      %37 = vector.multi_reduction <add>, %34, %cst_20 [1] : vector<16x16xf32> to vector<16xf32>
      %38 = vector.shape_cast %37 : vector<16xf32> to vector<16x1xf32>
      %39 = arith.addf %36, %38 : vector<16x1xf32>
      %c0_21 = arith.constant 0 : index
      %c0_22 = arith.constant 0 : index
      %40 = vector.load %arg8[%c0_21, %c0_22] : memref<16x1xf32, #tpu.memory_space<vmem>>, vector<16x1xf32>
      tpu.vector_store %arg8[%c0_21, %c0_22], %39 {strides = array<i32>} : memref<16x1xf32, #tpu.memory_space<vmem>>, vector<16x1xf32>,
      %c0_23 = arith.constant 0 : index
      %c0_24 = arith.constant 0 : index
      %41 = vector.load %arg9[%c0_23, %c0_24] : memref<16x128xf32, #tpu.memory_space<vmem>>, vector<16x128xf32>
      %42 = vector.broadcast %31 : vector<16x1xf32> to vector<16x128xf32>
      %43 = arith.mulf %42, %41 : vector<16x128xf32>
      %44 = arith.truncf %34 : vector<16x16xf32> to vector<16x16xbf16>
      %cst_25 = arith.constant dense<0.000000e+00> : vector<16x128xf32>
      %45 = tpu.matmul %44, %7, %cst_25 {dimension_numbers = #tpu.dot_dimension_numbers<[1], [0], [0], [1], [0, 0, 1, 1], [], []>} : vector<16x16xbf16>, vector<16x128xbf16>, vector<16x128xf32> -> vector<16x128xf32>
      %46 = arith.addf %43, %45 : vector<16x128xf32>
      %c0_26 = arith.constant 0 : index
      %c0_27 = arith.constant 0 : index
      %47 = vector.load %arg9[%c0_26, %c0_27] : memref<16x128xf32, #tpu.memory_space<vmem>>, vector<16x128xf32>
      tpu.vector_store %arg9[%c0_26, %c0_27], %46 {strides = array<i32>} : memref<16x128xf32, #tpu.memory_space<vmem>>, vector<16x128xf32>,
      %c0_28 = arith.constant 0 : index
      %c0_29 = arith.constant 0 : index
      %48 = vector.load %arg7[%c0_28, %c0_29] : memref<16x1xf32, #tpu.memory_space<vmem>>, vector<16x1xf32>
      tpu.vector_store %arg7[%c0_28, %c0_29], %29 {strides = array<i32>} : memref<16x1xf32, #tpu.memory_space<vmem>>, vector<16x1xf32>,
    } else {
    }
    %c0_i32_10 = arith.constant 0 : i32
    %12 = arith.cmpi ne, %arg2, %c0_i32_10 : i32
    %13 = arith.extui %12 : i1 to i32
    %c0_i32_11 = arith.constant 0 : i32
    %14 = arith.cmpi ne, %13, %c0_i32_11 : i32
    scf.if %14 {
      %c0_14 = arith.constant 0 : index
      %c0_15 = arith.constant 0 : index
      %18 = vector.load %arg7[%c0_14, %c0_15] : memref<16x1xf32, #tpu.memory_space<vmem>>, vector<16x1xf32>
      %cst_16 = arith.constant dense<0xFF800000> : vector<16xf32>
      %19 = vector.multi_reduction <maximumf>, %8, %cst_16 [1] : vector<16x16xf32> to vector<16xf32>
      %20 = vector.shape_cast %19 : vector<16xf32> to vector<16x1xf32>
      %21 = arith.maximumf %18, %20 : vector<16x1xf32>
      %22 = arith.subf %18, %21 : vector<16x1xf32>
      %23 = math.exp2 %22 : vector<16x1xf32>
      %24 = vector.broadcast %21 : vector<16x1xf32> to vector<16x16xf32>
      %25 = arith.subf %8, %24 : vector<16x16xf32>
      %26 = math.exp2 %25 : vector<16x16xf32>
      %c0_17 = arith.constant 0 : index
      %c0_18 = arith.constant 0 : index
      %27 = vector.load %arg8[%c0_17, %c0_18] : memref<16x1xf32, #tpu.memory_space<vmem>>, vector<16x1xf32>
      %28 = arith.mulf %23, %27 : vector<16x1xf32>
      %cst_19 = arith.constant dense<0.000000e+00> : vector<16xf32>
      %29 = vector.multi_reduction <add>, %26, %cst_19 [1] : vector<16x16xf32> to vector<16xf32>
      %30 = vector.shape_cast %29 : vector<16xf32> to vector<16x1xf32>
      %31 = arith.addf %28, %30 : vector<16x1xf32>
      %c0_20 = arith.constant 0 : index
      %c0_21 = arith.constant 0 : index
      %32 = vector.load %arg8[%c0_20, %c0_21] : memref<16x1xf32, #tpu.memory_space<vmem>>, vector<16x1xf32>
      tpu.vector_store %arg8[%c0_20, %c0_21], %31 {strides = array<i32>} : memref<16x1xf32, #tpu.memory_space<vmem>>, vector<16x1xf32>,
      %c0_22 = arith.constant 0 : index
      %c0_23 = arith.constant 0 : index
      %33 = vector.load %arg9[%c0_22, %c0_23] : memref<16x128xf32, #tpu.memory_space<vmem>>, vector<16x128xf32>
      %34 = vector.broadcast %23 : vector<16x1xf32> to vector<16x128xf32>
      %35 = arith.mulf %34, %33 : vector<16x128xf32>
      %36 = arith.truncf %26 : vector<16x16xf32> to vector<16x16xbf16>
      %cst_24 = arith.constant dense<0.000000e+00> : vector<16x128xf32>
      %37 = tpu.matmul %36, %7, %cst_24 {dimension_numbers = #tpu.dot_dimension_numbers<[1], [0], [0], [1], [0, 0, 1, 1], [], []>} : vector<16x16xbf16>, vector<16x128xbf16>, vector<16x128xf32> -> vector<16x128xf32>
      %38 = arith.addf %35, %37 : vector<16x128xf32>
      %c0_25 = arith.constant 0 : index
      %c0_26 = arith.constant 0 : index
      %39 = vector.load %arg9[%c0_25, %c0_26] : memref<16x128xf32, #tpu.memory_space<vmem>>, vector<16x128xf32>
      tpu.vector_store %arg9[%c0_25, %c0_26], %38 {strides = array<i32>} : memref<16x128xf32, #tpu.memory_space<vmem>>, vector<16x128xf32>,
      %c0_27 = arith.constant 0 : index
      %c0_28 = arith.constant 0 : index
      %40 = vector.load %arg7[%c0_27, %c0_28] : memref<16x1xf32, #tpu.memory_space<vmem>>, vector<16x1xf32>
      tpu.vector_store %arg7[%c0_27, %c0_28], %21 {strides = array<i32>} : memref<16x1xf32, #tpu.memory_space<vmem>>, vector<16x1xf32>,
    } else {
    }
    %c0_i32_12 = arith.constant 0 : i32
    %15 = arith.cmpi eq, %arg2, %c0_i32_12 : i32
    %16 = arith.extui %15 : i1 to i32
    %c0_i32_13 = arith.constant 0 : i32
    %17 = arith.cmpi ne, %16, %c0_i32_13 : i32
    scf.if %17 {
      %c0_14 = arith.constant 0 : index
      %c0_15 = arith.constant 0 : index
      %18 = vector.load %arg8[%c0_14, %c0_15] : memref<16x1xf32, #tpu.memory_space<vmem>>, vector<16x1xf32>
      %19 = tpu.reciprocal %18 {approx = true} : vector<16x1xf32> -> vector<16x1xf32>
      %c0_16 = arith.constant 0 : index
      %c0_17 = arith.constant 0 : index
      %20 = vector.load %arg9[%c0_16, %c0_17] : memref<16x128xf32, #tpu.memory_space<vmem>>, vector<16x128xf32>
      %21 = vector.broadcast %19 : vector<16x1xf32> to vector<16x128xf32>
      %22 = arith.mulf %20, %21 : vector<16x128xf32>
      %c0_18 = arith.constant 0 : index
      %c0_19 = arith.constant 0 : index
      %c0_20 = arith.constant 0 : index
      %23 = vector.load %arg6[%c0_18, %c0_19, %c0_20] : memref<1x16x128xf32, #tpu.memory_space<vmem>>, vector<1x16x128xf32>
      %24 = vector.shape_cast %23 : vector<1x16x128xf32> to vector<16x128xf32>
      %25 = vector.shape_cast %22 : vector<16x128xf32> to vector<1x16x128xf32>
      tpu.vector_store %arg6[%c0_18, %c0_19, %c0_20], %25 {strides = array<i32>} : memref<1x16x128xf32, #tpu.memory_space<vmem>>, vector<1x16x128xf32>,
    } else {
    }
    return
  }
  func.func @transform_0(%arg0: i32, %arg1: i32, %arg2: i32) -> (i32, i32, i32) {
    %c0_i32 = arith.constant 0 : i32
    %c0_i32_0 = arith.constant 0 : i32
    return %arg0, %arg1, %c0_i32 : i32, i32, i32
  }
  func.func @transform_1(%arg0: i32, %arg1: i32, %arg2: i32) -> (i32, i32, i32) {
    %c0_i32 = arith.constant 0 : i32
    %c0_i32_0 = arith.constant 0 : i32
    return %arg0, %arg2, %c0_i32 : i32, i32, i32
  }
  func.func @transform_2(%arg0: i32, %arg1: i32, %arg2: i32) -> (i32, i32, i32) {
    %c0_i32 = arith.constant 0 : i32
    %c0_i32_0 = arith.constant 0 : i32
    return %arg0, %arg2, %c0_i32 : i32, i32, i32
  }
  func.func @transform_3(%arg0: i32, %arg1: i32, %arg2: i32) -> (i32, i32, i32) {
    %c0_i32 = arith.constant 0 : i32
    %c0_i32_0 = arith.constant 0 : i32
    return %arg0, %arg1, %c0_i32 : i32, i32, i32
  }
}

</mosaic_0001>

<bundles_post_ra>
// kernel: tpu_custom_call.1
= control target key start
LH: loop header
LB: loop body
LE: loop exit
PB: predicated region body
PF: predicated region fallthrough
CT: control target
= control target key end

     0   :  { %s1454_s0 = inlined_call_operand.hbm [shape: bf16[2,16,128], index: 0, kind: input, shape index: {}]   ;;  %s1455_s1 = inlined_call_operand.hbm [shape: bf16[2,16,128], index: 1, kind: input, shape index: {}]   ;;  %s1456_s2 = inlined_call_operand.hbm [shape: bf16[2,16,128], index: 2, kind: input, shape index: {}]   ;;  %s1457_s3 = inlined_call_operand.hbm [shape: f32[2,16,128], index: 3, kind: output, shape index: {}]  }
   0x1   :  { %1467 = sst [smem:[#allocation19_spill]] %s1455_s1 }
   0x2   :  { %8 = vsyncpa [#allocation7], 0 }
   0x3   :  { %10 = vsyncpa [#allocation7 + $0x1], 0 }
   0x4   :  { %11 = vsyncpa [#allocation10], 0 }
   0x5   :  { %13 = vsyncpa [#allocation10 + $0x1], 0 }
   0x6   :  { %14 = vsyncpa [#allocation8], 0 }
   0x7   :  { %16 = vsyncpa [#allocation8 + $0x1], 0  ;;  %s1157_s12 = smov 0   ;;  %s1159_s13 = smov 0  }
   0x8   :  { %s1161_s14 = smov 0   ;;  %s1163_s15 = smov 0  }
   0x9   :  { %s1165_s16 = smov 0   ;;  %s1167_s17 = smov 0  }
   0xa LB: > { %1468 = sst [smem:[#allocation16_spill]] %s1119_s16  ;;  %s1188_s18 = sadd.s32 4294967295, %s1123_s17   ;;  %s1123_s17 = sphi %s1167_s17, %s22_s17   ;;  %s1119_s16 = sphi %s1165_s16, %s1495_s16   ;;  %s1115_s15 = sphi %s1163_s15, %s1490_s15   ;;  %s1111_s14 = sphi %s1161_s14, %s1494_s14   ;;  %s1107_s13 = sphi %s1159_s13, %s1493_s13   ;;  %s1103_s12 = sphi %s1157_s12, %s1492_s12  }
   0xb   : > { %s803_s19 = sadd.s32 4294967294, %s1123_s17   ;;  %s41_s20 = sadd.s32 1, %s1119_s16 }
   0xc   : > { %s50_s21 = sadd.s32 1, %s1111_s14  ;;  %p43_p0 = scmp.ge.s32.totalorder %s41_s20, 2 }
   0xd   : > { %p57_p1 = scmp.ne.s32.totalorder %s1111_s14, %s1107_s13  ;;  %p58_p2 = scmp.eq.s32.totalorder %s1123_s17, 0 }
   0xe   : > { %p63_p3 = scmp.ne.s32.totalorder %s1107_s13, %s1103_s12  ;;  %s1497_s20 = smov (%p43_p0, %s41_s20), 0 }
   0xf   : > { %1469 = sst [smem:[#allocation17_spill]] %s1497_s20  ;;  %p1200_p4 = por %p58_p2, %p57_p1 }
  0x10   : > { %p64_p5 = scmp.eq.s32.totalorder %s1188_s18, 0  ;;  %s45_s23 = ssub.s32 %s1119_s16, %s1497_s20 }
  0x11   : > { %p145_p6 = scmp.eq.s32.totalorder %s1188_s18, 1  ;;  %p48_p7 = scmp.eq.s32.totalorder %s45_s23, 0 }
  0x12   : > { %p1208_p8 = por %p64_p5, %p63_p3  ;;  %p151_p10 = scmp.eq.s32.totalorder %s803_s19, 1 }
  0x13   : > { %p1212_p9 = por %p145_p6, %p57_p1  ;;  %p873_p13 = scmp.lt.s32.totalorder %s1123_s17, 2 }
  0x14   : > { %s1471_s24 = scalar_select %p1208_p8, 1, 0 }
  0x15   : > { %s1472_s25 = scalar_select %p1212_p9, 1, 0 }
  0x16   : > { %s1217_s26 = scalar_select %p48_p7, %s1111_s14, %s50_s21  }
  0x17   : > { %p1219_p11 = por %p151_p10, %p63_p3  ;;  %s1460_s28 = sand.u32 1, %s1111_s14  }
  0x18   : > { %1473 = sst [smem:[#allocation18_spill]] %s1217_s26  ;;  %s1228_s29 = sshll.u32 %s1460_s28, 3 }
  0x19   : > { %s1474_s27 = scalar_select %p1219_p11, 1, 0 }
  0x1a   : > { %s1231_s30 = sshll.u32 %s1119_s16, 7  ;;  %p1235_p0 = pnand %p873_p13, %p1200_p4 }
  0x1b   : > { %s194_s5 = sand.u32 1, %s1123_s17   ;;  %s1476_s1 = sld [smem:[#allocation19_spill]] }
  0x1c   : > { %s198_s9 = scalar_lea.vmem [#allocation9], %s1228_s29  ;;  %s1251_s11 = scalar_lea.sflag [#allocation10], %s194_s5 }
  0x1d   : > { %s207_s10 = sshll.u32 %s198_s9, 4  ;;  %p1257_p4 = pneg %p1235_p0  ;;  %s1248_s10 = int_to_ptr.vmem [resolvable:$true] %s207_s10 }
  0x21   : > { %s1244_s8 = scalar_lea.hbm %s1476_s1, %s1231_s30  ;;  %s952_s6 = scalar_lea.hbm %s1476_s1, 256 }
  0x22   : > { %s947_s19 = scalar_lea.hbm %s1244_s8, 128  ;;  %p953_p7 = scmp.lt.u32.totalorder %s1244_s8, %s1476_s1 }
  0x23   : > { %p948_p3 = scmp.ne.s32.totalorder %s1244_s8, %s947_s19  ;;  %p954_p10 = scmp.lt.u32.totalorder %s952_s6, %s947_s19 }
  0x24   : > { %p956_p12 = scmp.lt.u32.totalorder %s947_s19, %s1244_s8 }
  0x25   : > { %p950_p5 = pnand %p1257_p4, %p948_p3  ;;  %p955_p13 = por %p954_p10, %p953_p7 }
  0x27   : > { %p951_p6 = pneg %p950_p5  ;;  %p957_p1 = por %p956_p12, %p955_p13 }
  0x29   : > { %p958_p2 = pnand %p957_p1, %p951_p6 }
  0x2b   : > { %961 = shalt.err (!%p958_p2)
}
  0x2c   : > { %s962_s5 = scalar_lea.vmem %s1248_s10, 128  ;;  %s1125_s22 = smov [#allocation9]  }
  0x2d   : > { %p963_p3 = scmp.ne.s32.totalorder %s1248_s10, %s962_s5  ;;  %s967_s23 = sshll.u32 %s1125_s22, 4  ;;  %s968_s23 = int_to_ptr.vmem [resolvable:$false] %s967_s23 }
  0x2e   : > { %s969_s7 = scalar_lea.vmem %s968_s23, 256  ;;  %p970_p9 = scmp.lt.s32.totalorder %s1248_s10, %s968_s23 }
  0x2f   : > { %p965_p5 = pnand %p963_p3, %p1257_p4  ;;  %p971_p8 = scmp.lt.s32.totalorder %s969_s7, %s962_s5 }
  0x31   : > { %p966_p11 = pneg %p965_p5  ;;  %p972_p7 = por %p971_p8, %p970_p9 }
  0x33   : > { %p973_p10 = pnand %p972_p7, %p966_p11 }
  0x35   : > { %976 = shalt.err (!%p973_p10)
}
  0x36   : > { %s1461_s19 = smov 64   ;;  %s1463_s6 = smov 4  }
  0x37   : > { %865 = dma.hbm_to_vmem [thread:$0]  (!%p1235_p0), %s1244_s8, 128, %s1248_s10, %s1251_s11, %s1461_s19, %s1461_s19, %s1463_s6  }
  0x38   : > { %p1478_p8 = scmp.lt.s32.totalorder %s1123_s17, 3  ;;  %p1479_p9 = scmp.ge.s32.totalorder %s1123_s17, 1 }
  0x39   : > { %s1296_s23 = scalar_lea.hbm %s1454_s0, %s1231_s30  ;;  %s175_s7 = scalar_lea.vmem [#allocation6], %s1228_s29 }
  0x3a   : > { %p1288_p11 = pnand %p1479_p9, %p1478_p8  ;;  %s184_s28 = sshll.u32 %s175_s7, 4  ;;  %s1299_s28 = int_to_ptr.vmem [resolvable:$true] %s184_s28 }
  0x3b   : > { %s1305_s19 = scalar_lea.hbm %s1456_s2, %s1231_s30  ;;  %s1481_s6 = sand.u32 1, %s1111_s14  }
  0x3c   : > { %s1480_s9 = scalar_select %p1288_p11, 1, 0 }
  0x3d   : > { %s1309_s1 = scalar_lea.sflag [#allocation7], %s1481_s6  ;;  %s977_s20 = scalar_lea.hbm %s1296_s23, 128 }
  0x3e   : > { %p978_p12 = scmp.ne.s32.totalorder %s1296_s23, %s977_s20  ;;  %s982_s16 = scalar_lea.hbm %s1454_s0, 256 }
  0x3f   : > { %p983_p6 = scmp.lt.u32.totalorder %s1296_s23, %s1454_s0  ;;  %p984_p13 = scmp.lt.u32.totalorder %s982_s16, %s977_s20 }
  0x40   : > { %p980_p1 = pnand %p978_p12, %p1257_p4  ;;  %p986_p5 = scmp.lt.u32.totalorder %s977_s20, %s1296_s23 }
  0x41   : > { %p985_p3 = por %p984_p13, %p983_p6 }
  0x42   : > { %p981_p2 = pneg %p980_p1 }
  0x43   : > { %p987_p7 = por %p986_p5, %p985_p3 }
  0x45   : > { %p988_p10 = pnand %p987_p7, %p981_p2 }
  0x47   : > { %991 = shalt.err (!%p988_p10)
}
  0x48   : > { %s992_s30 = scalar_lea.vmem %s1299_s28, 128  ;;  %s1128_s6 = smov [#allocation6]  }
  0x49   : > { %p993_p8 = scmp.ne.s32.totalorder %s1299_s28, %s992_s30  ;;  %s997_s8 = sshll.u32 %s1128_s6, 4  ;;  %s998_s8 = int_to_ptr.vmem [resolvable:$false] %s997_s8 }
  0x4a   : > { %s999_s26 = scalar_lea.vmem %s998_s8, 256  ;;  %p1000_p1 = scmp.lt.s32.totalorder %s1299_s28, %s998_s8 }
  0x4b   : > { %p995_p9 = pnand %p993_p8, %p1257_p4  ;;  %p1001_p11 = scmp.lt.s32.totalorder %s999_s26, %s992_s30 }
  0x4d   : > { %p996_p12 = pneg %p995_p9  ;;  %p1002_p6 = por %p1001_p11, %p1000_p1 }
  0x4f   : > { %p1003_p13 = pnand %p1002_p6, %p996_p12 }
  0x51   : > { %1006 = shalt.err (!%p1003_p13)
}
  0x52   : > { %s1482_s16 = smov 4   ;;  %s1483_s20 = smov 64  }
  0x53   : > { %862 = dma.hbm_to_vmem [thread:$0]  (!%p1235_p0), %s1296_s23, 128, %s1299_s28, %s1309_s1, %s1483_s20, %s1483_s20, %s1482_s16  }
  0x54   : > { %s221_s10 = scalar_lea.vmem [#allocation11], %s1228_s29  ;;  %s1007_s22 = scalar_lea.hbm %s1305_s19, 128 }
  0x55   : > { %s230_s5 = sshll.u32 %s221_s10, 4  ;;  %p1008_p11 = scmp.ne.s32.totalorder %s1305_s19, %s1007_s22  ;;  %s1337_s5 = int_to_ptr.vmem [resolvable:$true] %s230_s5 }
  0x56   : > { %s1012_s6 = scalar_lea.hbm %s1456_s2, 256  ;;  %p1013_p5 = scmp.lt.u32.totalorder %s1305_s19, %s1456_s2 }
  0x57   : > { %p1010_p2 = pnand %p1008_p11, %p1257_p4  ;;  %p1014_p7 = scmp.lt.u32.totalorder %s1012_s6, %s1007_s22 }
  0x58   : > { %p1016_p8 = scmp.lt.u32.totalorder %s1007_s22, %s1305_s19 }
  0x59   : > { %p1011_p3 = pneg %p1010_p2  ;;  %p1015_p10 = por %p1014_p7, %p1013_p5 }
  0x5b   : > { %p1017_p9 = por %p1016_p8, %p1015_p10 }
  0x5d   : > { %p1018_p12 = pnand %p1017_p9, %p1011_p3 }
  0x5f   : > { %1021 = shalt.err (!%p1018_p12)
}
  0x60   : > { %s1022_s1 = scalar_lea.vmem %s1337_s5, 128  ;;  %s1129_s28 = smov [#allocation11]  }
  0x61   : > { %p1023_p1 = scmp.ne.s32.totalorder %s1337_s5, %s1022_s1  ;;  %s1027_s29 = sshll.u32 %s1129_s28, 4  ;;  %s1028_s29 = int_to_ptr.vmem [resolvable:$false] %s1027_s29 }
  0x62   : > { %s1029_s23 = scalar_lea.vmem %s1028_s29, 256  ;;  %p1030_p11 = scmp.lt.s32.totalorder %s1337_s5, %s1028_s29 }
  0x63   : > { %p1025_p6 = pnand %p1023_p1, %p1257_p4  ;;  %p1031_p2 = scmp.lt.s32.totalorder %s1029_s23, %s1022_s1 }
  0x65   : > { %p1026_p13 = pneg %p1025_p6  ;;  %p1032_p5 = por %p1031_p2, %p1030_p11 }
  0x67   : > { %p1033_p7 = pnand %p1032_p5, %p1026_p13 }
  0x69   : > { %1036 = shalt.err (!%p1033_p7)
}
  0x6a   : > { %868 = dma.hbm_to_vmem [thread:$0]  (!%p1235_p0), %s1305_s19, 128, %s1337_s5, %s1251_s11, %s1483_s20, %s1483_s20, %s1482_s16  }
  0x6b   : > { %p1484_p4 = scmp.ne.s32.totalorder %s1480_s9, 0 }
  0x6c   : > { %s1367_s21 = sand.u32 (!%p1484_p4), 1, %s1107_s13   ;;  %p1485_p3 = scmp.ne.s32.totalorder (!%p1484_p4), %s1471_s24, 0 }
  0x6d   : > { %242 = sbr.rel (%p1484_p4) target bundleno = 942 (0x3ae), region = 32  ;;  %s1370_s10 = sshll.u32 (!%p1484_p4), %s1367_s21, 3 }
  0x6e   : > { %s245_s4 = scalar_lea.sflag (!%p1484_p4), [#allocation7], %s1367_s21  ;;  %s248_s22 = scalar_lea.vmem (!%p1484_p4), [#allocation6], %s1370_s10 }
  0x74   : > { %1090 = dma.done.wait (%p1485_p3), %s245_s4, 128  }
  0x75   : > { %1092 = vsyncadd (%p1485_p3), %s245_s4, 4294967168  ;;  %s253_s11 = sand.u32 1, %s1188_s18   ;;  %s257_s9 = scalar_lea.vmem [#allocation9], %s1370_s10 }
  0x76   : > { %s254_s19 = scalar_lea.sflag [#allocation10], %s253_s11 }
  0x77   : > { %1094 = dma.done.wait (%p1485_p3), %s254_s19, 256  }
  0x78   : > { %1096 = vsyncadd (%p1485_p3), %s254_s19, 4294967040  ;;  %v1130_v0 = vmov 0.0   ;;  %vm1131_vm0 = vmmov 0   ;;  %v933_v1 = vld [vmem:[%s257_s9] sm:$0xff]   ;;  %v316_v2 = vld [vmem:[%s248_s22] sm:$0xf]  ;;  %v383_v8 = vlaneseq }
  0x79   : > { %839 = vmatprep.subr.bf16.mxu0 %v1130_v0  ;;  %841 = vmatprep.mubr.msk.bf16.mxu0 %vm1131_vm0, %v1130_v0  ;;  %v317_v3 = vld [vmem:[%s248_s22 + $0x4] sm:$0xf]  ;;  %v318_v4 = vmul.bf16 1048788611, %v316_v2  ;;  %vm309_vm1 = vcmask 7168   ;;  %v1132_v7 = vmov -inf  }
  0x7a   : > { %845 = vmatprep.subr.bf16.mxu1 %v1130_v0  ;;  %847 = vmatprep.mubr.msk.bf16.mxu1 %vm1131_vm0, %v1130_v0  ;;  %v319_v5 = vmul.bf16 1048788611, %v317_v3  ;;  %310 = vst.msk [vmem:[#allocation2] sm:$0xff] %vm309_vm1, %v1132_v7  ;;  %311 = vst.msk [vmem:[#allocation2 + $0x8] sm:$0xff] %vm309_vm1, %v1132_v7  ;;  %v384_v9 = vand.u32 127, %v383_v8  ;;  %vm392_vm3 = vcmask 130048  }
  0x7b   : > { %840 = vmatpush3.bf16.xpose.msra.mxu0 %v933_v1  ;;  %312 = vst.msk [vmem:[#allocation3] sm:$0xff] %vm309_vm1, %v1130_v0  ;;  %313 = vst.msk [vmem:[#allocation3 + $0x8] sm:$0xff] %vm309_vm1, %v1130_v0  ;;  %v1133_v18 = vmov 0   ;;  %s266_s18 = scalar_lea.vmem [#allocation11], %s1370_s10  ;;  %s819_s24 = sshll.u32 %s1367_s21, 4 }
  0x7c   : > { %v820_v6 = vcombine.low %v318_v4, %v319_v5  ;;  %vm387_vm2 = vcmp.lt.s32.totalorder %v384_v9, 8  ;;  %931 = vset.pattern.permute.xlu1 %v1133_v18  ;;  %932 = vset.pattern.permute.xlu0 %v1133_v18  ;;  %v934_v27 = vld [vmem:[%s266_s18] sm:$0xff]   ;;  %s298_s16 = scalar_lea.vmem [#allocation12], %s819_s24  ;;  %s834_s5 = sshll.u32 %s1115_s15, 8 }
  0x7d   : > { %846 = vmatpush3.bf16.msra.mxu1 %v934_v27  ;;  %s663_s20 = sshll.u32 %s298_s16, 4  ;;  %s1405_s6 = scalar_lea.hbm %s1457_s3, %s834_s5  ;;  %s1400_s20 = int_to_ptr.vmem [resolvable:$true] %s663_s20 }
  0x7e   : > { %s648_s8 = scalar_lea.sflag [#allocation8], %s1367_s21  ;;  %s1037_s26 = scalar_lea.vmem %s1400_s20, 256 }
  0x7f   : > { %p1038_p0 = scmp.ne.s32.totalorder %s1400_s20, %s1037_s26  ;;  %p1486_p10 = scmp.ne.s32.totalorder %s1472_s25, 0 }
  0x80   : > { %s1134_s15 = smov [#allocation12]  }
  0x81   : > { %v390_v19 = vld [vmem:[#allocation2] sm:$0xff]  ;;  %v391_v22 = vld [vmem:[#allocation2 + $0x8] sm:$0xff]  ;;  %p1039_p8 = pnand %p1038_p0, %p1486_p10  ;;  %s1041_s1 = sshll.u32 %s1134_s15, 4  ;;  %s1042_s1 = int_to_ptr.vmem [resolvable:$false] %s1041_s1 }
  0x82   : > { %842 = vmatmul.mubr.bf16.vlgmr.msra.gmra.mrb[0].mxu0 %v820_v6  ;;  %v419_v39 = vld [vmem:[#allocation3] sm:$0xff]  ;;  %v420_v42 = vld [vmem:[#allocation3 + $0x8] sm:$0xff]  ;;  %s1043_s28 = scalar_lea.vmem %s1042_s1, 512  ;;  %p1044_p12 = scmp.lt.s32.totalorder %s1400_s20, %s1042_s1 }
  0x83   : > { %p1040_p9 = pneg %p1039_p8  ;;  %p1045_p1 = scmp.lt.s32.totalorder %s1043_s28, %s1037_s26 }
  0x85   : > { %p1046_p6 = por %p1045_p1, %p1044_p12 }
  0x87   : > { %p1047_p13 = pnand %p1046_p6, %p1040_p9 }
 0x155   : > { %v372_v10 = vpop.f32.mrb[0].mxu0 }
 0x156   : > { %v388_v11 = vsel %vm387_vm2, %v372_v10, -1e+30  ;;  %v843_v12 = vpop.f32.mrb[1].mxu0 }
 0x157   : > { %v375_v13 = vpop.f32.mrb[2].mxu0  ;;  %v393_v14 = vsel %vm392_vm3, %v388_v11, -inf }
 0x158   : > { %v389_v15 = vsel %vm387_vm2, %v375_v13, -1e+30  ;;  %394 = vmax.xlane.f32.xlu0 %v393_v14  ;;  %v844_v16 = vpop.f32.mrb[3].mxu0 }
 0x159   : > { %v396_v17 = vsel %vm392_vm3, %v389_v15, -inf }
 0x15c   : > { %397 = vmax.xlane.f32.xlu0 %v396_v17 }
 0x1e5   : > { %v395_v20 = vpop.xlane.xlu0 %394 }
 0x1e6   : > { %v399_v21 = vmax.f32 %v390_v19, %v395_v20 }
 0x1e8   : > { %v401_v23 = vsub.f32 %v390_v19, %v399_v21  ;;  %503 = vst.msk [vmem:[#allocation2] sm:$0xff] %vm309_vm1, %v399_v21  ;;  %407 = vperm.xlu1 %931, %v399_v21  }
 0x1e9   : > { %v398_v24 = vpop.xlane.xlu0 %397 }
 0x1ea   : > { %v400_v25 = vmax.f32 %v391_v22, %v398_v24 }
 0x1ec   : > { %v402_v26 = vsub.f32 %v391_v22, %v400_v25  ;;  %504 = vst.msk [vmem:[#allocation2 + $0x8] sm:$0xff] %vm309_vm1, %v400_v25  ;;  %412 = vperm.xlu1 %931, %v400_v25  }
 0x267   : > { %v408_v28 = vpop.permute.xlu1 %407 }
 0x268   : > { %v415_v29 = vsub.f32 %v388_v11, %v408_v28 }
 0x26a   : > { %935 = vpow2.f32 %v415_v29 }
 0x26b   : > { %v413_v30 = vpop.permute.xlu1 %412 }
 0x26c   : > { %v416_v31 = vsub.f32 %v389_v15, %v413_v30 }
 0x26e   : > { %937 = vpow2.f32 %v416_v31 }
 0x26f   : > { %939 = vpow2.f32 %v402_v26 }
 0x270   : > { %941 = vpow2.f32 %v401_v23 }
 0x274   : > { %v936_v32 = vpop.eup %935 }
 0x275   : > { %v423_v33 = vsel %vm392_vm3, %v936_v32, 0.0 }
 0x276   : > { %424 = vadd.xlane.f32.xlu0 %v423_v33 }
 0x278   : > { %v938_v34 = vpop.eup %937 }
 0x279   : > { %v426_v35 = vsel %vm392_vm3, %v938_v34, 0.0  ;;  %v448_v36 = vpack.c.bf16 %v938_v34, %v936_v32  ;;  %v940_v37 = vpop.eup %939 }
 0x27a   : > { %427 = vadd.xlane.f32.xlu1 %v426_v35  ;;  %v942_v38 = vpop.eup %941  ;;  %v422_v44 = vmul.f32 %v940_v37, %v420_v42 }
 0x27b   : > { %848 = vmatmul.mubr.msk.bf16.vlgmr.msra.gmra.mrb[0].mxu1 %vm392_vm3, %v448_v36  ;;  %v421_v40 = vmul.f32 %v942_v38, %v419_v39 }
 0x28b   : > { %443 = vperm.xlu1 %931, %v940_v37  }
 0x28c   : > { %438 = vperm.xlu0 %932, %v942_v38  }
 0x303   : > { %v425_v41 = vpop.xlane.xlu0 %424 }
 0x304   : > { %v429_v43 = vadd.f32 %v425_v41, %v421_v40 }
 0x306   : > { %432 = vst.msk [vmem:[#allocation3] sm:$0xff] %vm309_vm1, %v429_v43 }
 0x307   : > { %v428_v45 = vpop.xlane.xlu1 %427 }
 0x308   : > { %v430_v46 = vadd.f32 %v428_v45, %v422_v44 }
 0x30a   : > { %433 = vst.msk [vmem:[#allocation3 + $0x8] sm:$0xff] %vm309_vm1, %v430_v46 }
 0x30b   : > { %v439_v55 = vpop.permute.xlu0 %438  ;;  %v444_v57 = vpop.permute.xlu1 %443 }
 0x30c   : > { %v446_v56 = vmul.f32 0.0, %v439_v55  ;;  %v447_v60 = vmul.f32 0.0, %v444_v57 }
 0x30d   : > { %v627_v47 = vld [vmem:[#allocation3] sm:$0xff] }
 0x30e   : > { %943 = vrcp.f32 %v627_v47 }
 0x311   : > { %v628_v48 = vld [vmem:[#allocation3 + $0x8] sm:$0xff] }
 0x312   : > { %945 = vrcp.f32 %v628_v48 }
 0x318   : > { %v944_v49 = vpop.eup %943 }
 0x319   : > { %635 = vperm.xlu0 %932, %v944_v49  }
 0x31c   : > { %v946_v50 = vpop.eup %945 }
 0x31d   : > { %640 = vperm.xlu0 %932, %v946_v50  }
 0x34e   : > { %v492_v51 = vpop.f32.mrb[0].mxu1 }
 0x34f   : > { %v849_v52 = vpop.f32.mrb[1].mxu1  ;;  %v499_v58 = vadd.f32 %v492_v51, %v446_v56 }
 0x350   : > { %v495_v53 = vpop.f32.mrb[2].mxu1 }
 0x351   : > { %v850_v54 = vpop.f32.mrb[3].mxu1  ;;  %v500_v62 = vadd.f32 %v495_v53, %v447_v60 }
 0x398   : > { %v636_v59 = vpop.permute.xlu0 %635 }
 0x399   : > { %v643_v61 = vmul.f32 %v636_v59, %v499_v58 }
 0x39b   : > { %645 = vst [vmem:[%s298_s16] sm:$0xff] %v643_v61 }
 0x39c   : > { %v641_v63 = vpop.permute.xlu0 %640 }
 0x39d   : > { %v644_v0 = vmul.f32 %v641_v63, %v500_v62 }
 0x39f   : > { %646 = vst [vmem:[%s298_s16 + $0x8] sm:$0xff] %v644_v0 }
 0x3a0   : > { %1050 = shalt.err (!%p1047_p13)
}
 0x3a1   : > { %s1051_s29 = scalar_lea.hbm %s1405_s6, 256  ;;  %s1055_s4 = scalar_lea.hbm %s1457_s3, 512 }
 0x3a2   : > { %p1052_p11 = scmp.ne.s32.totalorder %s1405_s6, %s1051_s29  ;;  %p1056_p7 = scmp.lt.u32.totalorder %s1405_s6, %s1457_s3 }
 0x3a3   : > { %p1057_p4 = scmp.lt.u32.totalorder %s1055_s4, %s1051_s29  ;;  %p1059_p0 = scmp.lt.u32.totalorder %s1051_s29, %s1405_s6 }
 0x3a4   : > { %p1053_p2 = pnand %p1052_p11, %p1486_p10 }
 0x3a5   : > { %p1058_p3 = por %p1057_p4, %p1056_p7 }
 0x3a6   : > { %p1054_p5 = pneg %p1053_p2 }
 0x3a7   : > { %p1060_p8 = por %p1059_p0, %p1058_p3 }
 0x3a9   : > { %p1061_p9 = pnand %p1060_p8, %p1054_p5 }
 0x3ab   : > { %1064 = shalt.err (!%p1061_p9)
}
 0x3ac   : > { %s1135_s19 = smov 128   ;;  %s1136_s9 = smov 8  }
 0x3ad   : > { %857 = dma.vmem_to_hbm [thread:$0]  (%p1486_p10), %s1400_s20, 256, %s1405_s6, %s648_s8, %s1135_s19, %s1135_s19, %s1136_s9  }
 0x3ae PF: > { %s678_s18 = sand.u32 1, %s1103_s12   ;;  %p1487_p12 = scmp.ne.s32.totalorder %s1474_s27, 0 }
 0x3af   : > { %p1488_p1 = scmp.ge.s32.totalorder %s1123_s17, 2  ;;  %s679_s24 = scalar_lea.sflag [#allocation8], %s678_s18 }
 0x3b1   : > { %p870_p6 = pnand %p1488_p1, %p1487_p12 }
 0x3b3   : > { %1098 = dma.done.wait (!%p870_p6), %s679_s24, 256  }
 0x3b4   : > { %1100 = vsyncadd (!%p870_p6), %s679_s24, 4294967040  ;;  %s22_s17 = sadd.s32 1, %s1123_s17   ;;  %s1489_s16 = sld [smem:[#allocation18_spill]] }
 0x3b5   : > { %p19_p13 = scmp.ge.s32.totalorder %s22_s17, 4   ;;  %s1490_s15 = sld [smem:[#allocation16_spill]] }
 0x3b6   : > { %s1491_s25 = sld [smem:[#allocation17_spill]]  ;;  %s1492_s12 = smov %s1107_s13 }
 0x3b7   : > { %s1493_s13 = smov %s1111_s14  ;;  %21 = sbr.rel (!%p19_p13) target bundleno = 10 (0xa), region = 117 }
 0x3ba   : > { %s1494_s14 = smov %s1489_s16 }
 0x3bc   : > { %s1495_s16 = smov %s1491_s25 }
 0x3be   :  { %684 = vsyncpa [#allocation7], 1 }
 0x3bf   :  { %686 = vsyncpa [#allocation7 + $0x1], 1 }
 0x3c0   :  { %687 = vsyncpa [#allocation10], 1 }
 0x3c1   :  { %689 = vsyncpa [#allocation10 + $0x1], 1 }
 0x3c2   :  { %690 = vsyncpa [#allocation8], 1 }
 0x3c3   :  { %692 = vsyncpa [#allocation8 + $0x1], 1 }

</bundles_post_ra>
